<compile_context>
chip_gen: v6e
topology: v6e:2x2x1
jax: 0.10.0
libtpu: 0.0.40
codegen_flags: <defaults>
</compile_context>

<pallas_src>
import functools

import jax
import jax.numpy as jnp
from jax import lax
from jax.experimental import pallas as pl
from jax.experimental.pallas import tpu as pltpu


def _cdiv(a, b):
    return (a + b - 1) // b


def _round_up(x, m):
    return _cdiv(x, m) * m


# --------------------------------------------------------------------------
# Kernel
# --------------------------------------------------------------------------
def _rdrop_kernel(kl_ref, tgt_ref, l1_ref, l2_ref, out_ref,
                  m1_ref, s1_ref, a1_ref, m2_ref, s2_ref, a2_ref, pk_ref,
                  *, num_classes):
    """Grid = (row tiles, class tiles); class axis is an 'arbitrary' reduction.

    Scratch (all (TB,1) f32, per row of the current row tile):
      m*_ref : running max of logits            (online logsumexp)
      s*_ref : running sum of exp(l - m)        (softmax denominator)
      a*_ref : running sum of exp(l - m)*(l1-l2)   -> a/s == sum(p*(l1-l2))
      pk_ref : running l1[target] + l2[target]
    """
    j = pl.program_id(1)

    @pl.when(j == 0)
    def _init():
        neg_inf = jnp.full(m1_ref.shape, -jnp.inf, jnp.float32)
        zeros = jnp.zeros(s1_ref.shape, jnp.float32)
        m1_ref[...] = neg_inf
        m2_ref[...] = neg_inf
        s1_ref[...] = zeros
        s2_ref[...] = zeros
        a1_ref[...] = zeros
        a2_ref[...] = zeros
        pk_ref[...] = zeros

    l1 = l1_ref[...].astype(jnp.float32)            # (TB, TC)
    l2 = l2_ref[...].astype(jnp.float32)            # (TB, TC)
    tgt = tgt_ref[...]                              # (TB, 1) int32
    TB, TC = l1.shape

    # Global class index of every column in this block.
    col = j * TC + lax.broadcasted_iota(jnp.int32, (TB, TC), 1)

    # Mask the lane padding of a partial last class block (static check).
    if num_classes % TC != 0:
        valid = col < num_classes
        diff = jnp.where(valid, l1 - l2, 0.0)
        l1 = jnp.where(valid, l1, -jnp.inf)
        l2 = jnp.where(valid, l2, -jnp.inf)
    else:
        diff = l1 - l2

    # --- online logsumexp / KL-numerator update, generation 1 ---------------
    m1_old = m1_ref[...]
    m1_new = jnp.maximum(m1_old, jnp.max(l1, axis=-1, keepdims=True))
    c1 = jnp.exp(m1_old - m1_new)                   # rescale factor (EUP)
    e1 = jnp.exp(l1 - m1_new)
    s1_ref[...] = c1 * s1_ref[...] + jnp.sum(e1, axis=-1, keepdims=True)
    a1_ref[...] = c1 * a1_ref[...] + jnp.sum(e1 * diff, axis=-1, keepdims=True)
    m1_ref[...] = m1_new

    # --- generation 2 --------------------------------------------------------
    m2_old = m2_ref[...]
    m2_new = jnp.maximum(m2_old, jnp.max(l2, axis=-1, keepdims=True))
    c2 = jnp.exp(m2_old - m2_new)
    e2 = jnp.exp(l2 - m2_new)
    s2_ref[...] = c2 * s2_ref[...] + jnp.sum(e2, axis=-1, keepdims=True)
    a2_ref[...] = c2 * a2_ref[...] + jnp.sum(e2 * diff, axis=-1, keepdims=True)
    m2_ref[...] = m2_new

    # --- CE numerator: pick l1[t] + l2[t] with one masked reduction ----------
    pk_ref[...] = pk_ref[...] + jnp.sum(
        jnp.where(col == tgt, l1 + l2, 0.0), axis=-1, keepdims=True)

    # --- finalize on the last class block ------------------------------------
    @pl.when(j == pl.num_programs(1) - 1)
    def _finalize():
        s1 = s1_ref[...]
        s2 = s2_ref[...]
        lse1 = m1_ref[...] + jnp.log(s1)
        lse2 = m2_ref[...] + jnp.log(s2)
        ce = 0.5 * (lse1 + lse2 - pk_ref[...])
        # symmetric KL: sum((p1-p2)*(logp1-logp2)) == sum((p1-p2)*(l1-l2))
        #             == a1/s1 - a2/s2   (exact f32 divide on (TB,1) only)
        kl = 0.5 * (a1_ref[...] / s1 - a2_ref[...] / s2)
        loss = ce + kl_ref[0, 0] * kl               # (TB, 1) column
        # Lane-dense store: (TB,1) column -> (1,TB) row (cheap XLU transpose),
        # so the writeback DMA is contiguous instead of a masked strided store.
        out_ref[...] = jnp.transpose(loss).reshape(1, 1, TB)


# --------------------------------------------------------------------------
# Wrapper: tile selection + pallas_call
# --------------------------------------------------------------------------
def _vmem_capacity_bytes():
    """Physical VMEM per TensorCore (64 MiB v7x, 128 MiB v5e/v6e)."""
    try:
        return int(pltpu.get_tpu_info().vmem_capacity_bytes)
    except Exception:
        return 64 * 1024 * 1024  # conservative fallback = smallest (v7x)


def _logits_spec(block_shape, index_map, extra_buffering):
    """Logits BlockSpec; Buffered(3) on v5e/v6e where VMEM is plentiful."""
    if extra_buffering:
        try:
            return pl.BlockSpec(block_shape, index_map,
                                pipeline_mode=pl.Buffered(3))
        except (TypeError, AttributeError):
            pass
    return pl.BlockSpec(block_shape, index_map)


def _choose_tiles(B, C, itemsize, vmem_limit_bytes, n_buf, row_align):
    """Pick (row tile, class tile) for the 2-D grid.

    Accounting per (row, class) element: 2 logits streams x n_buf pipeline
    buffers at the input dtype, plus ~12 live f32 temporaries in the body.
    Per row: ~8 lane-padded (TB,1) f32 scratch accumulators.
    """
    budget = vmem_limit_bytes // 2
    bytes_per_elem = 2 * n_buf * itemsize + 12 * 4
    row_extra = 8 * 128 * 4

    tb_full = (budget // (C * bytes_per_elem + row_extra)) // row_align * row_align
    if tb_full >= 64 or C <= 2048:
        # Whole class dim as one block.
        tc = C
        tb = max(row_align, min(tb_full, 1024, _round_up(B, row_align)))
        # Keep ~4 row steps (>=2) so double-buffering / megacore engage, but
        # never drop below ~256 rows per step (per-step overhead).
        step_target = _round_up(max(_cdiv(B, 4), 1), row_align)
        tb_floor = min(256, _round_up(B, row_align))
        tb = min(tb, max(tb_floor, step_target))
    else:
        # Class dim too wide for one block: lane-aligned C chunks + online LSE.
        tb = min(256, _round_up(B, row_align))
        tc = (budget // (tb * bytes_per_elem)) // 128 * 128
        tc = int(max(128, min(tc, _round_up(C, 128))))
    return int(tb), int(tc)


def rdrop_loss(logits1, logits2, target, kl_weight=1.0,
               block_rows=None, block_cols=None):
    """Per-sample R-Drop loss.

    logits1, logits2: (B, C) float.  bf16 is the fast (HBM-friendly) path;
        f32 inputs work but double HBM traffic.  Math is done in f32 in-kernel.
    target: (B,) integer class indices (assumed valid; ignore_index=-100 of
        PyTorch CrossEntropyLoss is NOT handled).
    kl_weight: runtime scalar (SMEM), changing it does not trigger a recompile.
    block_rows/block_cols: optional tile overrides (testing / tuning).
    Returns: (B,) float32 per-sample losses.
    """
    B, C = logits1.shape
    assert logits2.shape == (B, C)
    itemsize = jnp.dtype(logits1.dtype).itemsize
    row_align = 8 if itemsize >= 4 else (16 if itemsize == 2 else 32)

    vmem_cap = _vmem_capacity_bytes()
    is_small_vmem = vmem_cap <= 64 * 1024 * 1024          # v7x (or unknown)
    # Raise the scoped VMEM limit above the default but keep headroom below
    # physical capacity (v7x: 48 MiB, v5e/v6e: ~96 MiB).
    vmem_limit = int(min((vmem_cap * 3) // 4, 100 * 1024 * 1024))
    extra_buffering = not is_small_vmem                    # Buffered(3) on v5e/v6e
    n_buf = 3 if extra_buffering else 2

    tb, tc = _choose_tiles(B, C, itemsize, vmem_limit, n_buf, row_align)
    if block_rows is not None:
        tb = int(block_rows)
    if block_cols is not None:
        tc = int(block_cols)

    n_i = _cdiv(B, tb)   # row tiles ("parallel"); tail block may be partial
    n_j = _cdiv(C, tc)   # class tiles ("arbitrary" reduction axis, innermost)

    tgt2d = target.astype(jnp.int32).reshape(B, 1)
    kl2d = jnp.asarray(kl_weight, dtype=jnp.float32).reshape(1, 1)

    out = pl.pallas_call(
        functools.partial(_rdrop_kernel, num_classes=C),
        out_shape=jax.ShapeDtypeStruct((n_i, 1, tb), jnp.float32),
        grid=(n_i, n_j),
        in_specs=[
            # runtime kl_weight scalar lives in SMEM (no recompile on change)
            pl.BlockSpec(memory_space=pltpu.MemorySpace.SMEM),
            pl.BlockSpec((tb, 1), lambda i, j: (i, 0)),
            _logits_spec((tb, tc), lambda i, j: (i, j), extra_buffering),
            _logits_spec((tb, tc), lambda i, j: (i, j), extra_buffering),
        ],
        # same block across j -> output stays resident over the reduction axis
        out_specs=pl.BlockSpec((1, 1, tb), lambda i, j: (i, 0, 0)),
        scratch_shapes=[pltpu.VMEM((tb, 1), jnp.float32)] * 7,
        compiler_params=pltpu.CompilerParams(
            dimension_semantics=("parallel", "arbitrary"),
            vmem_limit_bytes=vmem_limit,
        ),
    )(kl2d, tgt2d, logits1, logits2)

    # Tail rows (partial last row block) hold garbage; slice them off here.
    return out.reshape(n_i * tb)[:B]


# --------------------------------------------------------------------------
# Pure-JAX reference mirroring the PyTorch module
# --------------------------------------------------------------------------
def _rdrop_ref(logits1, logits2, target, kl_weight=1.0):
    logp1 = jax.nn.log_softmax(logits1, axis=-1)
    logp2 = jax.nn.log_softmax(logits2, axis=-1)
    p1 = jnp.exp(logp1)
    p2 = jnp.exp(logp2)
    onehot = jax.nn.one_hot(target, logits1.shape[-1], dtype=logits1.dtype)
    ce1 = -jnp.sum(onehot * logp1, axis=-1)
    ce2 = -jnp.sum(onehot * logp2, axis=-1)
    ce_loss = 0.5 * (ce1 + ce2)
    kl1 = jnp.sum(p2 * (logp2 - logp1), axis=-1)
    kl2 = jnp.sum(p1 * (logp1 - logp2), axis=-1)
    kl_loss = 0.5 * (kl1 + kl2)
    return ce_loss + kl_weight * kl_loss


if __name__ == "__main__":
    # RDrop has no learnable parameters (kl_weight=1.0 from __init__).
    # 1) basic case, auto tiles.
    B, C = 8, 32
    k1, k2, k3 = jax.random.split(jax.random.PRNGKey(0), 3)
    logits1 = jax.random.normal(k1, (B, C), dtype=jnp.float32)
    logits2 = jax.random.normal(k2, (B, C), dtype=jnp.float32)
    target = jax.random.randint(k3, (B,), 0, C, dtype=jnp.int32)
    loss = rdrop_loss(logits1, logits2, target, kl_weight=1.0)
    jax.block_until_ready(loss)
    ref = _rdrop_ref(logits1, logits2, target, kl_weight=1.0)
    assert loss.shape == (B,)
    assert jnp.allclose(loss, ref, atol=1e-5, rtol=1e-5), (loss, ref)

    # 2) B not a multiple of the row tile: partial tail block, no padding copy.
    B2, C2 = 5, 24
    kk = jax.random.split(jax.random.PRNGKey(1), 3)
    l1b = jax.random.normal(kk[0], (B2, C2), dtype=jnp.float32)
    l2b = jax.random.normal(kk[1], (B2, C2), dtype=jnp.float32)
    tgtb = jax.random.randint(kk[2], (B2,), 0, C2, dtype=jnp.int32)
    loss2 = rdrop_loss(l1b, l2b, tgtb, kl_weight=0.5)
    jax.block_until_ready(loss2)
    ref2 = _rdrop_ref(l1b, l2b, tgtb, kl_weight=0.5)
    assert loss2.shape == (B2,)
    assert jnp.allclose(loss2, ref2, atol=1e-5, rtol=1e-5), (loss2, ref2)

    # 3) bf16 logits + forced multi-step grid over rows AND classes: exercises
    #    the online-logsumexp class split, partial blocks (and lane masking)
    #    on both axes, and the runtime kl_weight scalar.
    B3, C3 = 20, 200
    kz = jax.random.split(jax.random.PRNGKey(2), 3)
    l1c = jax.random.normal(kz[0], (B3, C3), dtype=jnp.float32).astype(jnp.bfloat16)
    l2c = jax.random.normal(kz[1], (B3, C3), dtype=jnp.float32).astype(jnp.bfloat16)
    tgtc = jax.random.randint(kz[2], (B3,), 0, C3, dtype=jnp.int32)
    loss3 = rdrop_loss(l1c, l2c, tgtc, kl_weight=2.0,
                       block_rows=16, block_cols=128)
    jax.block_until_ready(loss3)
    ref3 = _rdrop_ref(l1c.astype(jnp.float32), l2c.astype(jnp.float32), tgtc,
                      kl_weight=2.0)
    assert loss3.shape == (B3,)
    assert jnp.allclose(loss3, ref3, atol=1e-4, rtol=1e-4), (loss3, ref3)

    print("KERNEL_OK")
</pallas_src>

<mosaic_0001>
module attributes {stable_mosaic.version = 11 : i64} {
  func.func @_rdrop_kernel(%arg0: i32, %arg1: i32, %arg2: memref<1x1xf32, #tpu.memory_space<smem>>, %arg3: memref<8x1xi32, #tpu.memory_space<vmem>>, %arg4: memref<8x32xf32, #tpu.memory_space<vmem>>, %arg5: memref<8x32xf32, #tpu.memory_space<vmem>>, %arg6: memref<1x1x8xf32, #tpu.memory_space<vmem>>, %arg7: memref<8x1xf32, #tpu.memory_space<vmem>>, %arg8: memref<8x1xf32, #tpu.memory_space<vmem>>, %arg9: memref<8x1xf32, #tpu.memory_space<vmem>>, %arg10: memref<8x1xf32, #tpu.memory_space<vmem>>, %arg11: memref<8x1xf32, #tpu.memory_space<vmem>>, %arg12: memref<8x1xf32, #tpu.memory_space<vmem>>, %arg13: memref<8x1xf32, #tpu.memory_space<vmem>>) attributes {dimension_semantics = [#tpu.dimension_semantics<parallel>, #tpu.dimension_semantics<arbitrary>], iteration_bounds = array<i64: 1, 1>, scalar_prefetch = 0 : i64, scratch_operands = 7 : i64, tpu.core_type = #tpu.core_type<tc>, window_params = [{transform_indices = @transform_0, window_bounds = array<i64: 1, 1>}, {transform_indices = @transform_1, window_bounds = array<i64: 8, 1>}, {transform_indices = @transform_2, window_bounds = array<i64: 8, 32>}, {transform_indices = @transform_3, window_bounds = array<i64: 8, 32>}, {transform_indices = @transform_4, window_bounds = array<i64: 1, 1, 8>}]} {
    %c0_i32 = arith.constant 0 : i32
    %0 = arith.cmpi eq, %arg1, %c0_i32 : i32
    %1 = arith.extui %0 : i1 to i32
    %c0_i32_0 = arith.constant 0 : i32
    %2 = arith.cmpi ne, %1, %c0_i32_0 : i32
    scf.if %2 {
      %cst_43 = arith.constant 0xFF800000 : f32
      %70 = vector.broadcast %cst_43 : f32 to vector<8x1xf32>
      %cst_44 = arith.constant 0.000000e+00 : f32
      %71 = vector.broadcast %cst_44 : f32 to vector<8x1xf32>
      %c0_45 = arith.constant 0 : index
      %c0_46 = arith.constant 0 : index
      %72 = vector.load %arg7[%c0_45, %c0_46] : memref<8x1xf32, #tpu.memory_space<vmem>>, vector<8x1xf32>
      tpu.vector_store %arg7[%c0_45, %c0_46], %70 {strides = array<i32>} : memref<8x1xf32, #tpu.memory_space<vmem>>, vector<8x1xf32>,
      %c0_47 = arith.constant 0 : index
      %c0_48 = arith.constant 0 : index
      %73 = vector.load %arg10[%c0_47, %c0_48] : memref<8x1xf32, #tpu.memory_space<vmem>>, vector<8x1xf32>
      tpu.vector_store %arg10[%c0_47, %c0_48], %70 {strides = array<i32>} : memref<8x1xf32, #tpu.memory_space<vmem>>, vector<8x1xf32>,
      %c0_49 = arith.constant 0 : index
      %c0_50 = arith.constant 0 : index
      %74 = vector.load %arg8[%c0_49, %c0_50] : memref<8x1xf32, #tpu.memory_space<vmem>>, vector<8x1xf32>
      tpu.vector_store %arg8[%c0_49, %c0_50], %71 {strides = array<i32>} : memref<8x1xf32, #tpu.memory_space<vmem>>, vector<8x1xf32>,
      %c0_51 = arith.constant 0 : index
      %c0_52 = arith.constant 0 : index
      %75 = vector.load %arg11[%c0_51, %c0_52] : memref<8x1xf32, #tpu.memory_space<vmem>>, vector<8x1xf32>
      tpu.vector_store %arg11[%c0_51, %c0_52], %71 {strides = array<i32>} : memref<8x1xf32, #tpu.memory_space<vmem>>, vector<8x1xf32>,
      %c0_53 = arith.constant 0 : index
      %c0_54 = arith.constant 0 : index
      %76 = vector.load %arg9[%c0_53, %c0_54] : memref<8x1xf32, #tpu.memory_space<vmem>>, vector<8x1xf32>
      tpu.vector_store %arg9[%c0_53, %c0_54], %71 {strides = array<i32>} : memref<8x1xf32, #tpu.memory_space<vmem>>, vector<8x1xf32>,
      %c0_55 = arith.constant 0 : index
      %c0_56 = arith.constant 0 : index
      %77 = vector.load %arg12[%c0_55, %c0_56] : memref<8x1xf32, #tpu.memory_space<vmem>>, vector<8x1xf32>
      tpu.vector_store %arg12[%c0_55, %c0_56], %71 {strides = array<i32>} : memref<8x1xf32, #tpu.memory_space<vmem>>, vector<8x1xf32>,
      %c0_57 = arith.constant 0 : index
      %c0_58 = arith.constant 0 : index
      %78 = vector.load %arg13[%c0_57, %c0_58] : memref<8x1xf32, #tpu.memory_space<vmem>>, vector<8x1xf32>
      tpu.vector_store %arg13[%c0_57, %c0_58], %71 {strides = array<i32>} : memref<8x1xf32, #tpu.memory_space<vmem>>, vector<8x1xf32>,
    } else {
    }
    %c0 = arith.constant 0 : index
    %c0_1 = arith.constant 0 : index
    %3 = vector.load %arg4[%c0, %c0_1] : memref<8x32xf32, #tpu.memory_space<vmem>>, vector<8x32xf32>
    %c0_2 = arith.constant 0 : index
    %c0_3 = arith.constant 0 : index
    %4 = vector.load %arg5[%c0_2, %c0_3] : memref<8x32xf32, #tpu.memory_space<vmem>>, vector<8x32xf32>
    %c0_4 = arith.constant 0 : index
    %c0_5 = arith.constant 0 : index
    %5 = vector.load %arg3[%c0_4, %c0_5] : memref<8x1xi32, #tpu.memory_space<vmem>>, vector<8x1xi32>
    %c32_i32 = arith.constant 32 : i32
    %6 = arith.muli %arg1, %c32_i32 : i32
    %7 = tpu.iota {dimensions = array<i32: 1>} : vector<8x32xi32>
    %8 = vector.broadcast %6 : i32 to vector<8x32xi32>
    %9 = arith.addi %8, %7 : vector<8x32xi32>
    %10 = arith.subf %3, %4 : vector<8x32xf32>
    %c0_6 = arith.constant 0 : index
    %c0_7 = arith.constant 0 : index
    %11 = vector.load %arg7[%c0_6, %c0_7] : memref<8x1xf32, #tpu.memory_space<vmem>>, vector<8x1xf32>
    %cst = arith.constant dense<0xFF800000> : vector<8xf32>
    %12 = vector.multi_reduction <maximumf>, %3, %cst [1] : vector<8x32xf32> to vector<8xf32>
    %13 = vector.shape_cast %12 : vector<8xf32> to vector<8x1xf32>
    %14 = arith.maximumf %11, %13 : vector<8x1xf32>
    %15 = arith.subf %11, %14 : vector<8x1xf32>
    %16 = math.exp %15 : vector<8x1xf32>
    %17 = vector.broadcast %14 : vector<8x1xf32> to vector<8x32xf32>
    %18 = arith.subf %3, %17 : vector<8x32xf32>
    %19 = math.exp %18 : vector<8x32xf32>
    %c0_8 = arith.constant 0 : index
    %c0_9 = arith.constant 0 : index
    %20 = vector.load %arg8[%c0_8, %c0_9] : memref<8x1xf32, #tpu.memory_space<vmem>>, vector<8x1xf32>
    %21 = arith.mulf %16, %20 : vector<8x1xf32>
    %cst_10 = arith.constant dense<0.000000e+00> : vector<8xf32>
    %22 = vector.multi_reduction <add>, %19, %cst_10 [1] : vector<8x32xf32> to vector<8xf32>
    %23 = vector.shape_cast %22 : vector<8xf32> to vector<8x1xf32>
    %24 = arith.addf %21, %23 : vector<8x1xf32>
    %c0_11 = arith.constant 0 : index
    %c0_12 = arith.constant 0 : index
    %25 = vector.load %arg8[%c0_11, %c0_12] : memref<8x1xf32, #tpu.memory_space<vmem>>, vector<8x1xf32>
    tpu.vector_store %arg8[%c0_11, %c0_12], %24 {strides = array<i32>} : memref<8x1xf32, #tpu.memory_space<vmem>>, vector<8x1xf32>,
    %c0_13 = arith.constant 0 : index
    %c0_14 = arith.constant 0 : index
    %26 = vector.load %arg9[%c0_13, %c0_14] : memref<8x1xf32, #tpu.memory_space<vmem>>, vector<8x1xf32>
    %27 = arith.mulf %16, %26 : vector<8x1xf32>
    %28 = arith.mulf %19, %10 : vector<8x32xf32>
    %cst_15 = arith.constant dense<0.000000e+00> : vector<8xf32>
    %29 = vector.multi_reduction <add>, %28, %cst_15 [1] : vector<8x32xf32> to vector<8xf32>
    %30 = vector.shape_cast %29 : vector<8xf32> to vector<8x1xf32>
    %31 = arith.addf %27, %30 : vector<8x1xf32>
    %c0_16 = arith.constant 0 : index
    %c0_17 = arith.constant 0 : index
    %32 = vector.load %arg9[%c0_16, %c0_17] : memref<8x1xf32, #tpu.memory_space<vmem>>, vector<8x1xf32>
    tpu.vector_store %arg9[%c0_16, %c0_17], %31 {strides = array<i32>} : memref<8x1xf32, #tpu.memory_space<vmem>>, vector<8x1xf32>,
    %c0_18 = arith.constant 0 : index
    %c0_19 = arith.constant 0 : index
    %33 = vector.load %arg7[%c0_18, %c0_19] : memref<8x1xf32, #tpu.memory_space<vmem>>, vector<8x1xf32>
    tpu.vector_store %arg7[%c0_18, %c0_19], %14 {strides = array<i32>} : memref<8x1xf32, #tpu.memory_space<vmem>>, vector<8x1xf32>,
    %c0_20 = arith.constant 0 : index
    %c0_21 = arith.constant 0 : index
    %34 = vector.load %arg10[%c0_20, %c0_21] : memref<8x1xf32, #tpu.memory_space<vmem>>, vector<8x1xf32>
    %cst_22 = arith.constant dense<0xFF800000> : vector<8xf32>
    %35 = vector.multi_reduction <maximumf>, %4, %cst_22 [1] : vector<8x32xf32> to vector<8xf32>
    %36 = vector.shape_cast %35 : vector<8xf32> to vector<8x1xf32>
    %37 = arith.maximumf %34, %36 : vector<8x1xf32>
    %38 = arith.subf %34, %37 : vector<8x1xf32>
    %39 = math.exp %38 : vector<8x1xf32>
    %40 = vector.broadcast %37 : vector<8x1xf32> to vector<8x32xf32>
    %41 = arith.subf %4, %40 : vector<8x32xf32>
    %42 = math.exp %41 : vector<8x32xf32>
    %c0_23 = arith.constant 0 : index
    %c0_24 = arith.constant 0 : index
    %43 = vector.load %arg11[%c0_23, %c0_24] : memref<8x1xf32, #tpu.memory_space<vmem>>, vector<8x1xf32>
    %44 = arith.mulf %39, %43 : vector<8x1xf32>
    %cst_25 = arith.constant dense<0.000000e+00> : vector<8xf32>
    %45 = vector.multi_reduction <add>, %42, %cst_25 [1] : vector<8x32xf32> to vector<8xf32>
    %46 = vector.shape_cast %45 : vector<8xf32> to vector<8x1xf32>
    %47 = arith.addf %44, %46 : vector<8x1xf32>
    %c0_26 = arith.constant 0 : index
    %c0_27 = arith.constant 0 : index
    %48 = vector.load %arg11[%c0_26, %c0_27] : memref<8x1xf32, #tpu.memory_space<vmem>>, vector<8x1xf32>
    tpu.vector_store %arg11[%c0_26, %c0_27], %47 {strides = array<i32>} : memref<8x1xf32, #tpu.memory_space<vmem>>, vector<8x1xf32>,
    %c0_28 = arith.constant 0 : index
    %c0_29 = arith.constant 0 : index
    %49 = vector.load %arg12[%c0_28, %c0_29] : memref<8x1xf32, #tpu.memory_space<vmem>>, vector<8x1xf32>
    %50 = arith.mulf %39, %49 : vector<8x1xf32>
    %51 = arith.mulf %42, %10 : vector<8x32xf32>
    %cst_30 = arith.constant dense<0.000000e+00> : vector<8xf32>
    %52 = vector.multi_reduction <add>, %51, %cst_30 [1] : vector<8x32xf32> to vector<8xf32>
    %53 = vector.shape_cast %52 : vector<8xf32> to vector<8x1xf32>
    %54 = arith.addf %50, %53 : vector<8x1xf32>
    %c0_31 = arith.constant 0 : index
    %c0_32 = arith.constant 0 : index
    %55 = vector.load %arg12[%c0_31, %c0_32] : memref<8x1xf32, #tpu.memory_space<vmem>>, vector<8x1xf32>
    tpu.vector_store %arg12[%c0_31, %c0_32], %54 {strides = array<i32>} : memref<8x1xf32, #tpu.memory_space<vmem>>, vector<8x1xf32>,
    %c0_33 = arith.constant 0 : index
    %c0_34 = arith.constant 0 : index
    %56 = vector.load %arg10[%c0_33, %c0_34] : memref<8x1xf32, #tpu.memory_space<vmem>>, vector<8x1xf32>
    tpu.vector_store %arg10[%c0_33, %c0_34], %37 {strides = array<i32>} : memref<8x1xf32, #tpu.memory_space<vmem>>, vector<8x1xf32>,
    %c0_35 = arith.constant 0 : index
    %c0_36 = arith.constant 0 : index
    %57 = vector.load %arg13[%c0_35, %c0_36] : memref<8x1xf32, #tpu.memory_space<vmem>>, vector<8x1xf32>
    %58 = vector.broadcast %5 : vector<8x1xi32> to vector<8x32xi32>
    %59 = arith.cmpi eq, %9, %58 : vector<8x32xi32>
    %60 = arith.addf %3, %4 : vector<8x32xf32>
    %cst_37 = arith.constant 0.000000e+00 : f32
    %61 = vector.broadcast %cst_37 : f32 to vector<8x32xf32>
    %62 = arith.select %59, %60, %61 : vector<8x32xi1>, vector<8x32xf32>
    %cst_38 = arith.constant dense<0.000000e+00> : vector<8xf32>
    %63 = vector.multi_reduction <add>, %62, %cst_38 [1] : vector<8x32xf32> to vector<8xf32>
    %64 = vector.shape_cast %63 : vector<8xf32> to vector<8x1xf32>
    %65 = arith.addf %57, %64 : vector<8x1xf32>
    %c0_39 = arith.constant 0 : index
    %c0_40 = arith.constant 0 : index
    %66 = vector.load %arg13[%c0_39, %c0_40] : memref<8x1xf32, #tpu.memory_space<vmem>>, vector<8x1xf32>
    tpu.vector_store %arg13[%c0_39, %c0_40], %65 {strides = array<i32>} : memref<8x1xf32, #tpu.memory_space<vmem>>, vector<8x1xf32>,
    %c0_i32_41 = arith.constant 0 : i32
    %67 = arith.cmpi eq, %arg1, %c0_i32_41 : i32
    %68 = arith.extui %67 : i1 to i32
    %c0_i32_42 = arith.constant 0 : i32
    %69 = arith.cmpi ne, %68, %c0_i32_42 : i32
    scf.if %69 {
      %c0_43 = arith.constant 0 : index
      %c0_44 = arith.constant 0 : index
      %70 = vector.load %arg8[%c0_43, %c0_44] : memref<8x1xf32, #tpu.memory_space<vmem>>, vector<8x1xf32>
      %c0_45 = arith.constant 0 : index
      %c0_46 = arith.constant 0 : index
      %71 = vector.load %arg11[%c0_45, %c0_46] : memref<8x1xf32, #tpu.memory_space<vmem>>, vector<8x1xf32>
      %c0_47 = arith.constant 0 : index
      %c0_48 = arith.constant 0 : index
      %72 = vector.load %arg7[%c0_47, %c0_48] : memref<8x1xf32, #tpu.memory_space<vmem>>, vector<8x1xf32>
      %73 = math.log %70 : vector<8x1xf32>
      %74 = arith.addf %72, %73 : vector<8x1xf32>
      %c0_49 = arith.constant 0 : index
      %c0_50 = arith.constant 0 : index
      %75 = vector.load %arg10[%c0_49, %c0_50] : memref<8x1xf32, #tpu.memory_space<vmem>>, vector<8x1xf32>
      %76 = math.log %71 : vector<8x1xf32>
      %77 = arith.addf %75, %76 : vector<8x1xf32>
      %78 = arith.addf %74, %77 : vector<8x1xf32>
      %c0_51 = arith.constant 0 : index
      %c0_52 = arith.constant 0 : index
      %79 = vector.load %arg13[%c0_51, %c0_52] : memref<8x1xf32, #tpu.memory_space<vmem>>, vector<8x1xf32>
      %80 = arith.subf %78, %79 : vector<8x1xf32>
      %cst_53 = arith.constant 5.000000e-01 : f32
      %81 = vector.broadcast %cst_53 : f32 to vector<8x1xf32>
      %82 = arith.mulf %81, %80 : vector<8x1xf32>
      %c0_54 = arith.constant 0 : index
      %c0_55 = arith.constant 0 : index
      %83 = vector.load %arg9[%c0_54, %c0_55] : memref<8x1xf32, #tpu.memory_space<vmem>>, vector<8x1xf32>
      %84 = arith.divf %83, %70 : vector<8x1xf32>
      %c0_56 = arith.constant 0 : index
      %c0_57 = arith.constant 0 : index
      %85 = vector.load %arg12[%c0_56, %c0_57] : memref<8x1xf32, #tpu.memory_space<vmem>>, vector<8x1xf32>
      %86 = arith.divf %85, %71 : vector<8x1xf32>
      %87 = arith.subf %84, %86 : vector<8x1xf32>
      %cst_58 = arith.constant 5.000000e-01 : f32
      %88 = vector.broadcast %cst_58 : f32 to vector<8x1xf32>
      %89 = arith.mulf %88, %87 : vector<8x1xf32>
      %c0_59 = arith.constant 0 : index
      %c0_60 = arith.constant 0 : index
      %90 = memref.load %arg2[%c0_59, %c0_60] : memref<1x1xf32, #tpu.memory_space<smem>>
      %91 = vector.broadcast %90 : f32 to vector<8x1xf32>
      %92 = arith.mulf %91, %89 : vector<8x1xf32>
      %93 = arith.addf %82, %92 : vector<8x1xf32>
      %94 = tpu.transpose %93, [1, 0] : vector<8x1xf32> -> vector<1x8xf32>
      %95 = vector.shape_cast %94 : vector<1x8xf32> to vector<1x1x8xf32>
      %c0_61 = arith.constant 0 : index
      %c0_62 = arith.constant 0 : index
      %c0_63 = arith.constant 0 : index
      %96 = vector.load %arg6[%c0_61, %c0_62, %c0_63] : memref<1x1x8xf32, #tpu.memory_space<vmem>>, vector<1x1x8xf32>
      tpu.vector_store %arg6[%c0_61, %c0_62, %c0_63], %95 {strides = array<i32>} : memref<1x1x8xf32, #tpu.memory_space<vmem>>, vector<1x1x8xf32>,
    } else {
    }
    return
  }
  func.func @transform_0(%arg0: i32, %arg1: i32) -> (i32, i32) {
    %c0_i32 = arith.constant 0 : i32
    %c0_i32_0 = arith.constant 0 : i32
    %c0_i32_1 = arith.constant 0 : i32
    return %c0_i32, %c0_i32_0 : i32, i32
  }
  func.func @transform_1(%arg0: i32, %arg1: i32) -> (i32, i32) {
    %c0_i32 = arith.constant 0 : i32
    %c0_i32_0 = arith.constant 0 : i32
    return %arg0, %c0_i32 : i32, i32
  }
  func.func @transform_2(%arg0: i32, %arg1: i32) -> (i32, i32) {
    %c0_i32 = arith.constant 0 : i32
    return %arg0, %arg1 : i32, i32
  }
  func.func @transform_3(%arg0: i32, %arg1: i32) -> (i32, i32) {
    %c0_i32 = arith.constant 0 : i32
    return %arg0, %arg1 : i32, i32
  }
  func.func @transform_4(%arg0: i32, %arg1: i32) -> (i32, i32, i32) {
    %c0_i32 = arith.constant 0 : i32
    %c0_i32_0 = arith.constant 0 : i32
    %c0_i32_1 = arith.constant 0 : i32
    return %arg0, %c0_i32, %c0_i32_0 : i32, i32, i32
  }
}

</mosaic_0001>

<bundles_post_ra>
// kernel: tpu_custom_call.1
= control target key start
LH: loop header
LB: loop body
LE: loop exit
PB: predicated region body
PF: predicated region fallthrough
CT: control target
= control target key end

     0   :  { %10 = vsyncpa [#allocation11], 0  ;;  %s341_s0 = inlined_call_operand.<no memory space> [shape: f32[1,1], index: 0, kind: input, shape index: {}]   ;;  %s342_s1 = inlined_call_operand.vmem [shape: s32[8,1], index: 1, kind: input, shape index: {}]   ;;  %s343_s2 = inlined_call_operand.vmem [shape: f32[8,32], index: 2, kind: input, shape index: {}]   ;;  %s344_s3 = inlined_call_operand.hbm [shape: f32[8,32], index: 3, kind: input, shape index: {}]   ;;  %s345_s4 = inlined_call_operand.hbm [shape: f32[1,1,8], index: 4, kind: output, shape index: {}]  }
   0x1   :  { %11 = vsyncpa [#allocation12], 0  ;;  %s275_s15 = smov [#allocation10]  }
   0x2   :  { %s24_s16 = sshll.u32 %s275_s15, 4  ;;  %s25_s16 = int_to_ptr.vmem [resolvable:$true] %s24_s16 }
   0x3   :  { %s239_s17 = scalar_lea.vmem %s25_s16, 128  ;;  %p244_p1 = scmp.lt.s32.totalorder %s25_s16, %s25_s16 }
   0x4   :  { %p240_p0 = scmp.ne.s32.totalorder %s25_s16, %s239_s17  ;;  %p245_p2 = scmp.lt.s32.totalorder %s239_s17, %s239_s17 }
   0x6   :  { %p246_p3 = por %p245_p2, %p244_p1 }
   0x8   :  { %p247_p4 = pnand %p246_p3, %p240_p0 }
   0xa   :  { %250 = shalt.err (!%p247_p4)
}
   0xb   :  { %27 = dma.hbm_to_vmem [thread:$0]  %s344_s3, 128, %s25_s16, [#allocation11]  }
   0xc   :  { %271 = dma.done.wait [#allocation11], 128  }
   0xd   :  { %272 = vsyncadd [#allocation11], 4294967168  ;;  %vm35_vm0 = vcmask 7168   ;;  %v276_v0 = vmov -inf   ;;  %vm53_vm1 = vcmask 261120   ;;  %v43_v1 = vld [vmem:[%s343_s2] sm:$0xff]  ;;  %v47_v22 = vlaneseq }
   0xe   :  { %36 = vst.msk [vmem:[#allocation2] sm:$0xff] %vm35_vm0, %v276_v0  ;;  %37 = vst.msk [vmem:[#allocation5] sm:$0xff] %vm35_vm0, %v276_v0  ;;  %v44_v2 = vld [vmem:[#allocation10] sm:$0xff]  ;;  %v54_v3 = vsel %vm53_vm1, %v43_v1, -inf  ;;  %v277_v5 = vmov 0   ;;  %v278_v6 = vmov 0.0  }
   0xf   :  { %55 = vmax.xlane.f32.xlu0 %v54_v3  ;;  %v87_v4 = vsel %vm53_vm1, %v44_v2, -inf  ;;  %213 = vset.pattern.permute.xlu1 %v277_v5  ;;  %38 = vst.msk [vmem:[#allocation3] sm:$0xff] %vm35_vm0, %v278_v6  ;;  %39 = vst.msk [vmem:[#allocation6] sm:$0xff] %vm35_vm0, %v278_v6  ;;  %v45_v7 = vld [vmem:[%s342_s1] sm:$0xff]  ;;  %v51_v25 = vsub.f32 %v43_v1, %v44_v2  ;;  %v48_v26 = vand.u32 127, %v47_v22  ;;  %s279_s23 = smov [#allocation13]  }
  0x10   :  { %214 = vset.pattern.permute.xlu0 %v277_v5  ;;  %40 = vst.msk [vmem:[#allocation4] sm:$0xff] %vm35_vm0, %v278_v6  ;;  %41 = vst.msk [vmem:[#allocation7] sm:$0xff] %vm35_vm0, %v278_v6  ;;  %v123_v29 = vadd.f32 %v44_v2, %v43_v1  ;;  %s199_s24 = sshll.u32 %s279_s23, 4  ;;  %vm191_vm3 = vcmask 57344   ;;  %s200_s24 = int_to_ptr.vmem [resolvable:$true] %s199_s24 }
  0x11   :  { %42 = vst.msk [vmem:[#allocation8] sm:$0xff] %vm35_vm0, %v278_v6  ;;  %s251_s25 = scalar_lea.vmem %s200_s24, 16  ;;  %s255_s26 = scalar_lea.vmem %s200_s24, 32 }
  0x12   :  { %p252_p5 = scmp.ne.s32.totalorder %s200_s24, %s251_s25  ;;  %p256_p6 = scmp.lt.s32.totalorder %s200_s24, %s200_s24 }
  0x13   :  { %88 = vmax.xlane.f32.xlu0 %v87_v4  ;;  %p257_p7 = scmp.lt.s32.totalorder %s255_s26, %s251_s25 }
  0x15   :  { %v52_v8 = vld [vmem:[#allocation2] sm:$0xff]  ;;  %v86_v11 = vld [vmem:[#allocation5] sm:$0xff]  ;;  %p258_p8 = por %p257_p7, %p256_p6 }
  0x16   :  { %v69_v40 = vld [vmem:[#allocation3] sm:$0xff]  ;;  %v102_v44 = vld [vmem:[#allocation6] sm:$0xff] }
  0x17   :  { %v109_v46 = vld [vmem:[#allocation7] sm:$0xff]  ;;  %v77_v49 = vld [vmem:[#allocation4] sm:$0xff]  ;;  %p259_p9 = pnand %p258_p8, %p252_p5 }
  0x18   :  { %v118_v57 = vld [vmem:[#allocation8] sm:$0xff] }
  0x29   :  { %120 = vperm.xlu0 %214, %v45_v7  }
  0x98   :  { %v56_v9 = vpop.xlane.xlu0 %55 }
  0x99   :  { %v57_v10 = vmax.f32 %v52_v8, %v56_v9 }
  0x9b   :  { %v58_v12 = vsub.f32 %v52_v8, %v57_v10  ;;  %85 = vst.msk [vmem:[#allocation2] sm:$0xff] %vm35_vm0, %v57_v10  ;;  %63 = vperm.xlu1 %213, %v57_v10  }
  0x9c   :  { %v89_v13 = vpop.xlane.xlu0 %88 }
  0x9d   :  { %v90_v14 = vmax.f32 %v86_v11, %v89_v13  ;;  %v59_v37 = vmul.f32 1.442695, %v58_v12 }
  0x9f   :  { %v91_v15 = vsub.f32 %v86_v11, %v90_v14  ;;  %117 = vst.msk [vmem:[#allocation5] sm:$0xff] %vm35_vm0, %v90_v14  ;;  %96 = vperm.xlu1 %213, %v90_v14  }
  0xa1   :  { %v92_v38 = vmul.f32 1.442695, %v91_v15 }
  0xa2   :  { %v135_v6 = vld [vmem:[#allocation2] sm:$0xff] }
  0xa4   :  { %v121_v27 = vpop.permute.xlu0 %120 }
  0xa5   :  { %vm122_vm2 = vcmp.eq.s32.totalorder %v48_v26, %v121_v27 }
  0xa6   :  { %v124_v34 = vsel %vm122_vm2, %v123_v29, 0.0  ;;  %v139_v7 = vld [vmem:[#allocation5] sm:$0xff] }
  0xa7   :  { %v125_v36 = vsel %vm53_vm1, %v124_v34, 0.0 }
 0x116   :  { %v64_v16 = vpop.permute.xlu1 %63 }
 0x117   :  { %v66_v17 = vsub.f32 %v43_v1, %v64_v16  ;;  %v156_v16 = vstv %s341_s0 }
 0x119   :  { %v67_v18 = vmul.f32 1.442695, %v66_v17 }
 0x11a   :  { %v97_v19 = vpop.permute.xlu1 %96 }
 0x11b   :  { %215 = vpow2.f32 %v67_v18  ;;  %v99_v20 = vsub.f32 %v44_v2, %v97_v19 }
 0x11d   :  { %v100_v21 = vmul.f32 1.442695, %v99_v20 }
 0x11f   :  { %217 = vpow2.f32 %v100_v21 }
 0x120   :  { %219 = vpow2.f32 %v59_v37 }
 0x121   :  { %221 = vpow2.f32 %v92_v38 }
 0x128   :  { %v216_v23 = vpop.eup %215 }
 0x129   :  { %v71_v24 = vsel %vm53_vm1, %v216_v23, 0.0  ;;  %v79_v32 = vmul.f32 %v216_v23, %v51_v25 }
 0x12a   :  { %72 = vadd.xlane.f32.xlu1 %v71_v24 }
 0x12b   :  { %v80_v35 = vsel %vm53_vm1, %v79_v32, 0.0 }
 0x12c   :  { %v218_v28 = vpop.eup %217 }
 0x12d   :  { %v104_v30 = vsel %vm53_vm1, %v218_v28, 0.0  ;;  %v111_v31 = vmul.f32 %v218_v28, %v51_v25  ;;  %v220_v39 = vpop.eup %219 }
 0x12e   :  { %105 = vadd.xlane.f32.xlu1 %v104_v30  ;;  %v70_v41 = vmul.f32 %v220_v39, %v69_v40  ;;  %v222_v42 = vpop.eup %221  ;;  %v78_v54 = vmul.f32 %v220_v39, %v77_v49 }
 0x12f   :  { %v112_v33 = vsel %vm53_vm1, %v111_v31, 0.0  ;;  %v103_v47 = vmul.f32 %v222_v42, %v102_v44  ;;  %v110_v51 = vmul.f32 %v222_v42, %v109_v46 }
 0x130   :  { %113 = vadd.xlane.f32.xlu0 %v112_v33 }
 0x132   :  { %81 = vadd.xlane.f32.xlu1 %v80_v35 }
 0x136   :  { %126 = vadd.xlane.f32.xlu1 %v125_v36 }
 0x1b3   :  { %v73_v43 = vpop.xlane.xlu1 %72 }
 0x1b4   :  { %v74_v45 = vadd.f32 %v73_v43, %v70_v41 }
 0x1b6   :  { %76 = vst.msk [vmem:[#allocation3] sm:$0xff] %vm35_vm0, %v74_v45 }
 0x1b7   :  { %v106_v48 = vpop.xlane.xlu1 %105 }
 0x1b8   :  { %v107_v50 = vadd.f32 %v106_v48, %v103_v47 }
 0x1b9   :  { %v114_v52 = vpop.xlane.xlu0 %113 }
 0x1ba   :  { %108 = vst.msk [vmem:[#allocation6] sm:$0xff] %vm35_vm0, %v107_v50  ;;  %v115_v53 = vadd.f32 %v114_v52, %v110_v51 }
 0x1bb   :  { %v82_v55 = vpop.xlane.xlu1 %81 }
 0x1bc   :  { %116 = vst.msk [vmem:[#allocation7] sm:$0xff] %vm35_vm0, %v115_v53  ;;  %v83_v56 = vadd.f32 %v82_v55, %v78_v54 }
 0x1bd   :  { %v133_v58 = vld [vmem:[#allocation3] sm:$0xff] }
 0x1be   :  { %84 = vst.msk [vmem:[#allocation4] sm:$0xff] %vm35_vm0, %v83_v56  ;;  %223 = vlog2.f32 %v133_v58 }
 0x1bf   :  { %v127_v59 = vpop.xlane.xlu1 %126  ;;  %225 = vrcp.f32 %v133_v58 }
 0x1c0   :  { %v128_v60 = vadd.f32 %v127_v59, %v118_v57 }
 0x1c1   :  { %v134_v61 = vld [vmem:[#allocation6] sm:$0xff] }
 0x1c2   :  { %129 = vst.msk [vmem:[#allocation8] sm:$0xff] %vm35_vm0, %v128_v60  ;;  %227 = vlog2.f32 %v134_v61 }
 0x1c3   :  { %229 = vrcp.f32 %v134_v61  ;;  %v150_v5 = vld [vmem:[#allocation7] sm:$0xff] }
 0x1c5   :  { %v147_v4 = vld [vmem:[#allocation4] sm:$0xff] }
 0x1c9   :  { %v144_v12 = vld [vmem:[#allocation8] sm:$0xff] }
 0x1cb   :  { %v224_v62 = vpop.eup %223 }
 0x1cc   :  { %v226_v63 = vpop.eup %225  ;;  %v137_v0 = vmul.f32 0.6931472, %v224_v62 }
 0x1cd   :  { %v149_v8 = vmul.f32 %v226_v63, %v147_v4 }
 0x1ce   :  { %v138_v10 = vadd.f32 %v137_v0, %v135_v6 }
 0x1cf   :  { %v228_v1 = vpop.eup %227 }
 0x1d0   :  { %v230_v2 = vpop.eup %229  ;;  %v141_v3 = vmul.f32 0.6931472, %v228_v1 }
 0x1d1   :  { %v152_v9 = vmul.f32 %v230_v2, %v150_v5 }
 0x1d2   :  { %v142_v11 = vadd.f32 %v141_v3, %v139_v7 }
 0x1d3   :  { %v153_v13 = vsub.f32 %v149_v8, %v152_v9 }
 0x1d4   :  { %v143_v14 = vadd.f32 %v142_v11, %v138_v10 }
 0x1d5   :  { %v154_v15 = vmul.f32 0.5, %v153_v13 }
 0x1d6   :  { %v145_v17 = vsub.f32 %v143_v14, %v144_v12 }
 0x1d7   :  { %v157_v19 = vmul.f32 %v156_v16, %v154_v15 }
 0x1d8   :  { %v146_v18 = vmul.f32 0.5, %v145_v17 }
 0x1da   :  { %v158_v20 = vadd.f32 %v157_v19, %v146_v18 }
 0x1dc   :  { %159 = vxpose.xlu1.b32.start.end [1/1] (short) (narrow) %v158_v20, 8 }
 0x258   :  { %v175_v21 = vpop.trf.xlu1 }
 0x259   :  { %192 = vst.msk [vmem:[#allocation13] sm:$0x1] %vm191_vm3, %v175_v21 }
 0x25a   :  { %262 = shalt.err (!%p259_p9)
}
 0x25b   :  { %202 = dma.vmem_to_hbm [thread:$0]  %s200_s24, 16, %s345_s4, [#allocation12]  }
 0x25c   :  { %273 = dma.done.wait [#allocation12], 16  }
 0x25d   :  { %274 = vsyncadd [#allocation12], 4294967280 }
 0x25e   :  { %206 = vsyncpa [#allocation11], 1 }
 0x25f   :  { %207 = vsyncpa [#allocation12], 1 }

</bundles_post_ra>
